<compile_context>
chip_gen: v7x
topology: tpu7x:2x2x1
jax: 0.10.0
libtpu: 0.0.40
codegen_flags: <defaults>
</compile_context>

<pallas_src>
import functools

import jax
import jax.numpy as jnp
from jax.experimental import pallas as pl
from jax.experimental.pallas import tpu as pltpu


def _round_up(x, m):
    return ((x + m - 1) // m) * m


def _cross_network_kernel(x_ref, w_ref, b_ref, o_ref, *, layer_num, parameterization):
    """Fused CrossNetwork forward for one batch tile.

    x_ref: (TB, Dp)    input tile (x_0)
    w_ref: (L, 1, Dp)  vector kernels   OR  (L, Dp, Dp) pre-transposed matrix kernels
    b_ref: (L, 1, Dp)  biases
    o_ref: (TB, Dp)    output tile (x_L)
    """
    x0 = x_ref[...].astype(jnp.float32)          # (TB, Dp)
    w_all = w_ref[...].astype(jnp.float32)       # loaded once, VMEM-resident across layers
    b_all = b_ref[...].astype(jnp.float32)       # (L, 1, Dp)

    xl = x0
    for i in range(layer_num):                   # static unrolled loop (layer_num is small)
        b = b_all[i]                             # (1, Dp), broadcasts over batch rows
        if parameterization == "vector":
            w = w_all[i]                                        # (1, Dp)
            s = jnp.sum(xl * w, axis=-1, keepdims=True)          # (TB, 1)  cross-lane reduce
            xl = x0 * s + b + xl
        elif parameterization == "matrix":
            wt = w_all[i]                                        # (Dp, Dp), already W_i^T
            xlw = jnp.dot(xl, wt, preferred_element_type=jnp.float32) + b
            xl = x0 * xlw + xl
        else:
            raise ValueError("parameterization should be 'vector' or 'matrix'")

    o_ref[...] = xl.astype(o_ref.dtype)


def cross_network_forward(x, kernels, bias, parameterization="vector", *, max_block_b=512):
    """CrossNetwork forward as one fused Pallas kernel.

    x:       (B, D) float32
    kernels: (L, D, 1) for 'vector'  or  (L, D, D) for 'matrix'
    bias:    (L, D, 1)
    returns  (B, D)
    """
    B, D = x.shape
    L = kernels.shape[0]

    Dp = _round_up(max(D, 128), 128)             # lane-dense feature dim (unmasked vst)
    TB = min(_round_up(max(B, 8), 8), max_block_b)
    Bp = _round_up(B, TB)

    # Zero-pad input and parameters (padding contributes exactly zero to the math).
    x_p = jnp.zeros((Bp, Dp), x.dtype).at[:B, :D].set(x)
    b_p = jnp.zeros((L, 1, Dp), jnp.float32).at[:, 0, :D].set(bias[:, :, 0])
    if parameterization == "vector":
        w_p = jnp.zeros((L, 1, Dp), jnp.float32).at[:, 0, :D].set(kernels[:, :, 0])
    elif parameterization == "matrix":
        # Store W_i^T so the in-kernel contraction is a plain row-major x_l @ W^T.
        w_p = jnp.zeros((L, Dp, Dp), jnp.float32).at[:, :D, :D].set(
            jnp.swapaxes(kernels, 1, 2))
    else:
        raise ValueError("parameterization should be 'vector' or 'matrix'")

    kernel = functools.partial(
        _cross_network_kernel, layer_num=L, parameterization=parameterization)

    out = pl.pallas_call(
        kernel,
        out_shape=jax.ShapeDtypeStruct((Bp, Dp), x.dtype),
        grid_spec=pltpu.PrefetchScalarGridSpec(
            num_scalar_prefetch=0,
            grid=(Bp // TB,),
            in_specs=[
                pl.BlockSpec((TB, Dp), lambda i: (i, 0)),        # batch tile of x_0
                pl.BlockSpec(w_p.shape, lambda i: (0, 0, 0)),    # all-layer kernels, resident
                pl.BlockSpec(b_p.shape, lambda i: (0, 0, 0)),    # all-layer biases, resident
            ],
            out_specs=pl.BlockSpec((TB, Dp), lambda i: (i, 0)),
        ),
        compiler_params=pltpu.CompilerParams(
            dimension_semantics=("parallel",),       # megacore-shard the batch axis (v7x)
            vmem_limit_bytes=32 * 1024 * 1024,       # safe on v5e/v6e (128 MiB) and v7x (64 MiB)
        ),
    )(x_p, w_p, b_p)

    return out[:B, :D]


def init_cross_network_params(key, in_features, layer_num, parameterization="vector"):
    """Xavier-normal kernels (matching nn.init.xavier_normal_), zero biases."""
    if parameterization == "vector":
        kshape = (layer_num, in_features, 1)
        std = (2.0 / (in_features + 1)) ** 0.5
    elif parameterization == "matrix":
        kshape = (layer_num, in_features, in_features)
        std = (2.0 / (in_features + in_features)) ** 0.5
    else:
        raise ValueError("parameterization should be 'vector' or 'matrix'")
    kernels = std * jax.random.normal(key, kshape, jnp.float32)
    bias = jnp.zeros((layer_num, in_features, 1), jnp.float32)
    return kernels, bias


def _reference_forward(x, kernels, bias, parameterization="vector"):
    """Pure-JAX transcription of CrossNetwork.forward (PyTorch semantics)."""
    x0 = x[:, :, None]                       # (B, D, 1)
    xl = x0
    for i in range(kernels.shape[0]):
        if parameterization == "vector":
            xl_w = jnp.tensordot(xl, kernels[i], axes=([1], [0]))   # (B, 1, 1)
            dot_ = jnp.matmul(x0, xl_w)                              # (B, D, 1)
            xl = dot_ + bias[i] + xl
        else:
            xl_w = jnp.matmul(kernels[i], xl)                        # (B, D, 1)
            dot_ = xl_w + bias[i]
            xl = x0 * dot_ + xl
    return xl[:, :, 0]


if __name__ == "__main__":
    # Small shapes consistent with the module: CrossNetwork(in_features=32, layer_num=2)
    # applied to x of shape [batch=8, 32].
    in_features = 32
    layer_num = 2
    batch = 8

    key = jax.random.PRNGKey(0)
    key, xk, vk, mk = jax.random.split(key, 4)
    x = jax.random.normal(xk, (batch, in_features), jnp.float32)

    # Default 'vector' parameterization.
    kern_v, bias_v = init_cross_network_params(vk, in_features, layer_num, "vector")
    out_v = jax.block_until_ready(cross_network_forward(x, kern_v, bias_v, "vector"))
    ref_v = _reference_forward(x, kern_v, bias_v, "vector")
    assert out_v.shape == (batch, in_features)
    assert jnp.allclose(out_v, ref_v, atol=1e-5, rtol=1e-5), "vector parameterization mismatch"

    # 'matrix' parameterization (also supported by the module).
    kern_m, bias_m = init_cross_network_params(mk, in_features, layer_num, "matrix")
    out_m = jax.block_until_ready(cross_network_forward(x, kern_m, bias_m, "matrix"))
    ref_m = _reference_forward(x, kern_m, bias_m, "matrix")
    assert out_m.shape == (batch, in_features)
    assert jnp.allclose(out_m, ref_m, atol=1e-5, rtol=1e-5), "matrix parameterization mismatch"

    print("KERNEL_OK")
</pallas_src>

<mosaic_0001>
module attributes {stable_mosaic.version = 11 : i64} {
  func.func @_cross_network_kernel(%arg0: i32, %arg1: memref<8x128xf32, #tpu.memory_space<vmem>>, %arg2: memref<2x1x128xf32, #tpu.memory_space<vmem>>, %arg3: memref<2x1x128xf32, #tpu.memory_space<vmem>>, %arg4: memref<8x128xf32, #tpu.memory_space<vmem>>) attributes {dimension_semantics = [#tpu.dimension_semantics<parallel>], iteration_bounds = array<i64: 1>, scalar_prefetch = 0 : i64, scratch_operands = 0 : i64, tpu.core_type = #tpu.core_type<tc>, window_params = [{transform_indices = @transform_0, window_bounds = array<i64: 8, 128>}, {pipeline_mode = #tpu.pipeline_mode<synchronous>, transform_indices = @transform_1, window_bounds = array<i64: 2, 1, 128>}, {pipeline_mode = #tpu.pipeline_mode<synchronous>, transform_indices = @transform_2, window_bounds = array<i64: 2, 1, 128>}, {transform_indices = @transform_3, window_bounds = array<i64: 8, 128>}]} {
    %c0 = arith.constant 0 : index
    %c0_0 = arith.constant 0 : index
    %0 = vector.load %arg1[%c0, %c0_0] : memref<8x128xf32, #tpu.memory_space<vmem>>, vector<8x128xf32>
    %c0_1 = arith.constant 0 : index
    %c0_2 = arith.constant 0 : index
    %c0_3 = arith.constant 0 : index
    %1 = vector.load %arg2[%c0_1, %c0_2, %c0_3] : memref<2x1x128xf32, #tpu.memory_space<vmem>>, vector<2x1x128xf32>
    %c0_4 = arith.constant 0 : index
    %c0_5 = arith.constant 0 : index
    %c0_6 = arith.constant 0 : index
    %2 = vector.load %arg3[%c0_4, %c0_5, %c0_6] : memref<2x1x128xf32, #tpu.memory_space<vmem>>, vector<2x1x128xf32>
    %3 = vector.extract_strided_slice %2 {offsets = [0, 0, 0], sizes = [1, 1, 128], strides = [1, 1, 1]} : vector<2x1x128xf32> to vector<1x1x128xf32>
    %4 = vector.shape_cast %3 : vector<1x1x128xf32> to vector<1x128xf32>
    %5 = vector.extract_strided_slice %1 {offsets = [0, 0, 0], sizes = [1, 1, 128], strides = [1, 1, 1]} : vector<2x1x128xf32> to vector<1x1x128xf32>
    %6 = vector.shape_cast %5 : vector<1x1x128xf32> to vector<1x128xf32>
    %7 = vector.broadcast %6 : vector<1x128xf32> to vector<8x128xf32>
    %8 = arith.mulf %0, %7 : vector<8x128xf32>
    %cst = arith.constant dense<0.000000e+00> : vector<8xf32>
    %9 = vector.multi_reduction <add>, %8, %cst [1] : vector<8x128xf32> to vector<8xf32>
    %10 = vector.shape_cast %9 : vector<8xf32> to vector<8x1xf32>
    %11 = vector.broadcast %10 : vector<8x1xf32> to vector<8x128xf32>
    %12 = arith.mulf %0, %11 : vector<8x128xf32>
    %13 = vector.broadcast %4 : vector<1x128xf32> to vector<8x128xf32>
    %14 = arith.addf %12, %13 : vector<8x128xf32>
    %15 = arith.addf %14, %0 : vector<8x128xf32>
    %16 = vector.extract_strided_slice %2 {offsets = [1, 0, 0], sizes = [1, 1, 128], strides = [1, 1, 1]} : vector<2x1x128xf32> to vector<1x1x128xf32>
    %17 = vector.shape_cast %16 : vector<1x1x128xf32> to vector<1x128xf32>
    %18 = vector.extract_strided_slice %1 {offsets = [1, 0, 0], sizes = [1, 1, 128], strides = [1, 1, 1]} : vector<2x1x128xf32> to vector<1x1x128xf32>
    %19 = vector.shape_cast %18 : vector<1x1x128xf32> to vector<1x128xf32>
    %20 = vector.broadcast %19 : vector<1x128xf32> to vector<8x128xf32>
    %21 = arith.mulf %15, %20 : vector<8x128xf32>
    %cst_7 = arith.constant dense<0.000000e+00> : vector<8xf32>
    %22 = vector.multi_reduction <add>, %21, %cst_7 [1] : vector<8x128xf32> to vector<8xf32>
    %23 = vector.shape_cast %22 : vector<8xf32> to vector<8x1xf32>
    %24 = vector.broadcast %23 : vector<8x1xf32> to vector<8x128xf32>
    %25 = arith.mulf %0, %24 : vector<8x128xf32>
    %26 = vector.broadcast %17 : vector<1x128xf32> to vector<8x128xf32>
    %27 = arith.addf %25, %26 : vector<8x128xf32>
    %28 = arith.addf %27, %15 : vector<8x128xf32>
    %c0_8 = arith.constant 0 : index
    %c0_9 = arith.constant 0 : index
    %29 = vector.load %arg4[%c0_8, %c0_9] : memref<8x128xf32, #tpu.memory_space<vmem>>, vector<8x128xf32>
    tpu.vector_store %arg4[%c0_8, %c0_9], %28 {strides = array<i32>} : memref<8x128xf32, #tpu.memory_space<vmem>>, vector<8x128xf32>,
    return
  }
  func.func @transform_0(%arg0: i32) -> (i32, i32) {
    %c0_i32 = arith.constant 0 : i32
    %c0_i32_0 = arith.constant 0 : i32
    return %arg0, %c0_i32 : i32, i32
  }
  func.func @transform_1(%arg0: i32) -> (i32, i32, i32) {
    %c0_i32 = arith.constant 0 : i32
    %c0_i32_0 = arith.constant 0 : i32
    %c0_i32_1 = arith.constant 0 : i32
    %c0_i32_2 = arith.constant 0 : i32
    return %c0_i32, %c0_i32_0, %c0_i32_1 : i32, i32, i32
  }
  func.func @transform_2(%arg0: i32) -> (i32, i32, i32) {
    %c0_i32 = arith.constant 0 : i32
    %c0_i32_0 = arith.constant 0 : i32
    %c0_i32_1 = arith.constant 0 : i32
    %c0_i32_2 = arith.constant 0 : i32
    return %c0_i32, %c0_i32_0, %c0_i32_1 : i32, i32, i32
  }
  func.func @transform_3(%arg0: i32) -> (i32, i32) {
    %c0_i32 = arith.constant 0 : i32
    %c0_i32_0 = arith.constant 0 : i32
    return %arg0, %c0_i32 : i32, i32
  }
}

</mosaic_0001>

<bundles_post_ra>
// kernel: tpu_custom_call.1
= control target key start
LH: loop header
LB: loop body
LE: loop exit
PB: predicated region body
PF: predicated region fallthrough
CT: control target
= control target key end

     0   :  { %8 = vsyncpa [#allocation3], 0  ;;  %s196_s0 = inlined_call_operand.hbm [shape: f32[8,128], index: 0, kind: input, shape index: {}]   ;;  %s197_s1 = inlined_call_operand.vmem [shape: f32[2,1,128], index: 1, kind: input, shape index: {}]   ;;  %s198_s2 = inlined_call_operand.vmem [shape: f32[2,1,128], index: 2, kind: input, shape index: {}]   ;;  %s199_s3 = inlined_call_operand.hbm [shape: f32[8,128], index: 3, kind: output, shape index: {}]  }
   0x1   :  { %9 = vsyncpa [#allocation4], 0  ;;  %s138_s12 = smov [#allocation2]   ;;  %s90_s16 = scalar_lea.hbm %s196_s0, 128 }
   0x2   :  { %s16_s13 = sshll.u32 %s138_s12, 4  ;;  %p91_p0 = scmp.ne.s32.totalorder %s196_s0, %s90_s16  ;;  %s17_s13 = int_to_ptr.vmem [resolvable:$true] %s16_s13 }
   0x3   :  { %p94_p1 = scmp.lt.u32.totalorder %s90_s16, %s196_s0 }
   0x5   :  { %p96_p2 = pnand %p94_p1, %p91_p0 }
   0x7   :  { %99 = shalt.err (!%p96_p2)
}
   0x8   :  { %s100_s21 = scalar_lea.vmem %s17_s13, 128  ;;  %p105_p4 = scmp.lt.s32.totalorder %s17_s13, %s17_s13 }
   0x9   :  { %p101_p3 = scmp.ne.s32.totalorder %s17_s13, %s100_s21  ;;  %p106_p5 = scmp.lt.s32.totalorder %s100_s21, %s100_s21 }
   0xb   :  { %p107_p6 = por %p106_p5, %p105_p4 }
   0xd   :  { %p108_p7 = pnand %p107_p6, %p101_p3 }
   0xf   :  { %111 = shalt.err (!%p108_p7)
}
  0x10   :  { %19 = dma.hbm_to_vmem [thread:$0]  %s196_s0, 128, %s17_s13, [#allocation3]  }
  0x11   :  { %134 = dma.done.wait [#allocation3], 128  }
  0x12   :  { %135 = vsyncadd [#allocation3], 4294967168  ;;  %v27_v0 = vld [vmem:[#allocation2] sm:$0xff]  ;;  %s139_s4 = smov [#allocation5]  }
  0x13   :  { %v84_v1 = vld [vmem:[%s197_s1] ss:$0 sm:$0xff]  ;;  %v86_v7 = vld [vmem:[%s197_s1 + $0x1] ss:$0 sm:$0xff]  ;;  %s75_s5 = sshll.u32 %s139_s4, 4  ;;  %s76_s5 = int_to_ptr.vmem [resolvable:$true] %s75_s5 }
  0x14   :  { %v38_v2 = vmul.f32 %v84_v1, %v27_v0  ;;  %v85_v3 = vld [vmem:[%s198_s2] ss:$0 sm:$0xff]  ;;  %v87_v10 = vld [vmem:[%s198_s2 + $0x1] ss:$0 sm:$0xff]  ;;  %s112_s6 = scalar_lea.vmem %s76_s5, 128  ;;  %p117_p9 = scmp.lt.s32.totalorder %s76_s5, %s76_s5 }
  0x15   :  { %p113_p8 = scmp.ne.s32.totalorder %s76_s5, %s112_s6  ;;  %p118_p10 = scmp.lt.s32.totalorder %s112_s6, %s112_s6 }
  0x16   :  { %39 = vadd.xlane.f32.xlu0 %v38_v2 }
  0x17   :  { %p119_p11 = por %p118_p10, %p117_p9 }
  0x19   :  { %p120_p12 = pnand %p119_p11, %p113_p8 }
  0xa3   :  { %v40_v4 = vpop.xlane.xlu0 %39 }
  0xa4   :  { %v41_v5 = vmul.f32 %v40_v4, %v27_v0 }
  0xa6   :  { %v48_v6 = vadd.f32 %v85_v3, %v41_v5 }
  0xa8   :  { %v49_v8 = vadd.f32 %v48_v6, %v27_v0 }
  0xaa   :  { %v56_v9 = vmul.f32 %v86_v7, %v49_v8 }
  0xac   :  { %57 = vadd.xlane.f32.xlu0 %v56_v9 }
 0x139   :  { %v58_v11 = vpop.xlane.xlu0 %57 }
 0x13a   :  { %v59_v12 = vmul.f32 %v58_v11, %v27_v0 }
 0x13c   :  { %v66_v13 = vadd.f32 %v87_v10, %v59_v12 }
 0x13e   :  { %v67_v14 = vadd.f32 %v66_v13, %v49_v8 }
 0x140   :  { %68 = vst [vmem:[#allocation5] sm:$0xff] %v67_v14 }
 0x141   :  { %123 = shalt.err (!%p120_p12)
}
 0x142   :  { %s124_s8 = scalar_lea.hbm %s199_s3, 128 }
 0x143   :  { %p125_p13 = scmp.ne.s32.totalorder %s199_s3, %s124_s8  ;;  %p128_p0 = scmp.lt.u32.totalorder %s124_s8, %s199_s3 }
 0x145   :  { %p130_p1 = pnand %p128_p0, %p125_p13 }
 0x147   :  { %133 = shalt.err (!%p130_p1)
}
 0x148   :  { %78 = dma.vmem_to_hbm [thread:$0]  %s76_s5, 128, %s199_s3, [#allocation4]  }
 0x149   :  { %136 = dma.done.wait [#allocation4], 128  }
 0x14a   :  { %137 = vsyncadd [#allocation4], 4294967168 }
 0x14b   :  { %82 = vsyncpa [#allocation3], 1 }
 0x14c   :  { %83 = vsyncpa [#allocation4], 1 }

</bundles_post_ra>
